<compile_context>
chip_gen: v5e
topology: v5e:2x2
jax: 0.10.0
libtpu: 0.0.40
codegen_flags: <defaults>
</compile_context>

<pallas_src>
import jax
import jax.numpy as jnp
from jax.experimental import pallas as pl
from jax.experimental.pallas import tpu as pltpu


def _round_up(x, m):
    return (x + m - 1) // m * m


def _make_infonce_kernel(n_valid, block_n, dot_dtype, needs_mask):
    """Builds the tiled InfoNCE kernel body (closes over static config)."""
    eps2 = 1e-24  # (F.normalize eps=1e-12)^2, clamp applied to the sum of squares

    def kernel(q_ref, pk_ref, pi_ref, out_ref, m_sc, l_sc, diag_sc):
        k = pl.program_id(1)
        nk = pl.num_programs(1)

        # Normalize the query row tile: rsqrt (EUP) + one multiply (VALU).
        q = q_ref[...].astype(jnp.float32)
        q_inv = jax.lax.rsqrt(
            jnp.maximum(jnp.sum(q * q, axis=-1, keepdims=True), eps2))
        qn = q * q_inv

        # Normalize the key tile.
        pk = pk_ref[...].astype(jnp.float32)
        pk_inv = jax.lax.rsqrt(
            jnp.maximum(jnp.sum(pk * pk, axis=-1, keepdims=True), eps2))
        pkn = pk * pk_inv

        @pl.when(k == 0)
        def _():
            # Init online-LSE state and compute the diagonal (positive logit)
            # directly as a row-wise dot: diag_i = <qn_i, pn_i>.
            m_sc[...] = jnp.full_like(m_sc, -jnp.inf)
            l_sc[...] = jnp.zeros_like(l_sc)
            pi = pi_ref[...].astype(jnp.float32)
            pi_inv = jax.lax.rsqrt(
                jnp.maximum(jnp.sum(pi * pi, axis=-1, keepdims=True), eps2))
            diag_sc[...] = jnp.sum(qn * (pi * pi_inv), axis=-1, keepdims=True)

        # (block_n, block_n) similarity logits on the MXU: contract last dims of
        # both operands (no transpose/relayout of the key tile).
        s = jax.lax.dot_general(
            qn.astype(dot_dtype), pkn.astype(dot_dtype),
            dimension_numbers=(((1,), (1,)), ((), ())),
            preferred_element_type=jnp.float32)

        if needs_mask:
            # Mask padded key columns to -inf so they do not contribute to the LSE.
            col = k * block_n + jax.lax.broadcasted_iota(jnp.int32, (1, block_n), 1)
            s = jnp.where(col < n_valid, s, -jnp.inf)

        # Online (numerically stable) log-sum-exp update.
        m_prev = m_sc[...]
        m_new = jnp.maximum(m_prev, jnp.max(s, axis=-1, keepdims=True))
        l_sc[...] = (jnp.exp(m_prev - m_new) * l_sc[...]
                     + jnp.sum(jnp.exp(s - m_new), axis=-1, keepdims=True))
        m_sc[...] = m_new

        @pl.when(k == nk - 1)
        def _():
            lse = m_sc[...] + jnp.log(l_sc[...])
            out_ref[...] = lse - diag_sc[...]  # per-row cross-entropy

    return kernel


def infonce_loss(query, positive_key, *, block_n=None):
    """InfoNCE loss (negative_keys=None, reduction='mean'), Pallas TPU kernel."""
    assert query.ndim == 2 and positive_key.ndim == 2
    assert query.shape == positive_key.shape
    n, d = query.shape

    # Lane-pad the feature dim to 128 (zeros are inert for norms / dot products).
    d_pad = _round_up(d, 128)

    # Tile size: biggest row/key tile that still fits the default scoped VMEM on
    # every generation (incl. v7x's 64 MiB physical VMEM) with 2-deep buffering.
    if block_n is None:
        block_n = min(256, _round_up(n, 8))
    block_n = max(8, _round_up(block_n, 8))

    n_pad = _round_up(n, block_n)
    needs_mask = n_pad != n

    # Feed the MXU in bf16 when inputs are bf16 (f32 accumulation kept).
    dot_dtype = jnp.bfloat16 if query.dtype == jnp.bfloat16 else jnp.float32

    q = query
    p = positive_key
    if (n_pad, d_pad) != (n, d):
        q = jnp.pad(q, ((0, n_pad - n), (0, d_pad - d)))
        p = jnp.pad(p, ((0, n_pad - n), (0, d_pad - d)))

    grid = (n_pad // block_n, n_pad // block_n)
    kernel = _make_infonce_kernel(
        n_valid=n, block_n=block_n, dot_dtype=dot_dtype, needs_mask=needs_mask)

    per_row = pl.pallas_call(
        kernel,
        out_shape=jax.ShapeDtypeStruct((n_pad, 1), jnp.float32),
        grid_spec=pltpu.PrefetchScalarGridSpec(
            num_scalar_prefetch=0,
            grid=grid,
            in_specs=[
                pl.BlockSpec((block_n, d_pad), lambda i, k: (i, 0)),  # query rows
                pl.BlockSpec((block_n, d_pad), lambda i, k: (k, 0)),  # key columns
                pl.BlockSpec((block_n, d_pad), lambda i, k: (i, 0)),  # positives (diag)
            ],
            out_specs=pl.BlockSpec((block_n, 1), lambda i, k: (i, 0)),
            scratch_shapes=[
                pltpu.VMEM((block_n, 1), jnp.float32),  # running max m_i
                pltpu.VMEM((block_n, 1), jnp.float32),  # running sum l_i
                pltpu.VMEM((block_n, 1), jnp.float32),  # diagonal (positive) logit
            ],
        ),
        compiler_params=pltpu.CompilerParams(
            dimension_semantics=("parallel", "arbitrary")),
    )(q, p, p)

    # reduction='mean' over the true (unpadded) rows.
    return jnp.mean(per_row[:n, 0])


def _infonce_ref(query, positive_key):
    """Pure-JAX reference for correctness checking."""
    eps = 1e-12
    qn = query / jnp.maximum(jnp.linalg.norm(query, axis=-1, keepdims=True), eps)
    pn = positive_key / jnp.maximum(
        jnp.linalg.norm(positive_key, axis=-1, keepdims=True), eps)
    logits = qn @ pn.T
    n = logits.shape[0]
    logp = jax.nn.log_softmax(logits, axis=-1)
    return -jnp.mean(logp[jnp.arange(n), jnp.arange(n)])


if __name__ == "__main__":
    key = jax.random.PRNGKey(0)
    k1, k2, k3, k4 = jax.random.split(key, 4)

    # Case 1: single-tile path (batch of 8 embedding pairs, hidden dim 32).
    q1 = jax.random.normal(k1, (8, 32), dtype=jnp.float32)
    p1 = jax.random.normal(k2, (8, 32), dtype=jnp.float32)
    loss1 = infonce_loss(q1, p1)
    jax.block_until_ready(loss1)
    ref1 = _infonce_ref(q1, p1)
    assert jnp.allclose(loss1, ref1, atol=1e-5, rtol=1e-5), (loss1, ref1)

    # Case 2: multi-tile grid + padded-key masking (N=20 with 8-row tiles).
    q2 = jax.random.normal(k3, (20, 48), dtype=jnp.float32)
    p2 = jax.random.normal(k4, (20, 48), dtype=jnp.float32)
    loss2 = infonce_loss(q2, p2, block_n=8)
    jax.block_until_ready(loss2)
    ref2 = _infonce_ref(q2, p2)
    assert jnp.allclose(loss2, ref2, atol=1e-5, rtol=1e-5), (loss2, ref2)

    print("KERNEL_OK")
</pallas_src>

<mosaic_0001>
module attributes {stable_mosaic.version = 11 : i64} {
  func.func @kernel(%arg0: i32, %arg1: i32, %arg2: memref<8x128xf32, #tpu.memory_space<vmem>>, %arg3: memref<8x128xf32, #tpu.memory_space<vmem>>, %arg4: memref<8x128xf32, #tpu.memory_space<vmem>>, %arg5: memref<8x1xf32, #tpu.memory_space<vmem>>, %arg6: memref<8x1xf32, #tpu.memory_space<vmem>>, %arg7: memref<8x1xf32, #tpu.memory_space<vmem>>, %arg8: memref<8x1xf32, #tpu.memory_space<vmem>>) attributes {dimension_semantics = [#tpu.dimension_semantics<parallel>, #tpu.dimension_semantics<arbitrary>], iteration_bounds = array<i64: 1, 1>, scalar_prefetch = 0 : i64, scratch_operands = 3 : i64, tpu.core_type = #tpu.core_type<tc>, window_params = [{transform_indices = @transform_0, window_bounds = array<i64: 8, 128>}, {transform_indices = @transform_1, window_bounds = array<i64: 8, 128>}, {transform_indices = @transform_2, window_bounds = array<i64: 8, 128>}, {transform_indices = @transform_3, window_bounds = array<i64: 8, 1>}]} {
    %c0 = arith.constant 0 : index
    %c0_0 = arith.constant 0 : index
    %0 = vector.load %arg2[%c0, %c0_0] : memref<8x128xf32, #tpu.memory_space<vmem>>, vector<8x128xf32>
    %1 = arith.mulf %0, %0 : vector<8x128xf32>
    %cst = arith.constant dense<0.000000e+00> : vector<8xf32>
    %2 = vector.multi_reduction <add>, %1, %cst [1] : vector<8x128xf32> to vector<8xf32>
    %3 = vector.shape_cast %2 : vector<8xf32> to vector<8x1xf32>
    %cst_1 = arith.constant 1.000000e-24 : f32
    %4 = vector.broadcast %cst_1 : f32 to vector<8x1xf32>
    %5 = arith.maximumf %3, %4 : vector<8x1xf32>
    %6 = math.rsqrt %5 : vector<8x1xf32>
    %7 = vector.broadcast %6 : vector<8x1xf32> to vector<8x128xf32>
    %8 = arith.mulf %0, %7 : vector<8x128xf32>
    %c0_2 = arith.constant 0 : index
    %c0_3 = arith.constant 0 : index
    %9 = vector.load %arg3[%c0_2, %c0_3] : memref<8x128xf32, #tpu.memory_space<vmem>>, vector<8x128xf32>
    %10 = arith.mulf %9, %9 : vector<8x128xf32>
    %cst_4 = arith.constant dense<0.000000e+00> : vector<8xf32>
    %11 = vector.multi_reduction <add>, %10, %cst_4 [1] : vector<8x128xf32> to vector<8xf32>
    %12 = vector.shape_cast %11 : vector<8xf32> to vector<8x1xf32>
    %cst_5 = arith.constant 1.000000e-24 : f32
    %13 = vector.broadcast %cst_5 : f32 to vector<8x1xf32>
    %14 = arith.maximumf %12, %13 : vector<8x1xf32>
    %15 = math.rsqrt %14 : vector<8x1xf32>
    %16 = vector.broadcast %15 : vector<8x1xf32> to vector<8x128xf32>
    %17 = arith.mulf %9, %16 : vector<8x128xf32>
    %c0_i32 = arith.constant 0 : i32
    %18 = arith.cmpi eq, %arg1, %c0_i32 : i32
    %19 = arith.extui %18 : i1 to i32
    %c0_i32_6 = arith.constant 0 : i32
    %20 = arith.cmpi ne, %19, %c0_i32_6 : i32
    scf.if %20 {
      %cst_20 = arith.constant 0xFF800000 : f32
      %41 = vector.broadcast %cst_20 : f32 to vector<8x1xf32>
      %c0_21 = arith.constant 0 : index
      %c0_22 = arith.constant 0 : index
      %42 = vector.load %arg6[%c0_21, %c0_22] : memref<8x1xf32, #tpu.memory_space<vmem>>, vector<8x1xf32>
      tpu.vector_store %arg6[%c0_21, %c0_22], %41 {strides = array<i32>} : memref<8x1xf32, #tpu.memory_space<vmem>>, vector<8x1xf32>,
      %cst_23 = arith.constant 0.000000e+00 : f32
      %43 = vector.broadcast %cst_23 : f32 to vector<8x1xf32>
      %c0_24 = arith.constant 0 : index
      %c0_25 = arith.constant 0 : index
      %44 = vector.load %arg7[%c0_24, %c0_25] : memref<8x1xf32, #tpu.memory_space<vmem>>, vector<8x1xf32>
      tpu.vector_store %arg7[%c0_24, %c0_25], %43 {strides = array<i32>} : memref<8x1xf32, #tpu.memory_space<vmem>>, vector<8x1xf32>,
      %c0_26 = arith.constant 0 : index
      %c0_27 = arith.constant 0 : index
      %45 = vector.load %arg4[%c0_26, %c0_27] : memref<8x128xf32, #tpu.memory_space<vmem>>, vector<8x128xf32>
      %46 = arith.mulf %45, %45 : vector<8x128xf32>
      %cst_28 = arith.constant dense<0.000000e+00> : vector<8xf32>
      %47 = vector.multi_reduction <add>, %46, %cst_28 [1] : vector<8x128xf32> to vector<8xf32>
      %48 = vector.shape_cast %47 : vector<8xf32> to vector<8x1xf32>
      %cst_29 = arith.constant 1.000000e-24 : f32
      %49 = vector.broadcast %cst_29 : f32 to vector<8x1xf32>
      %50 = arith.maximumf %48, %49 : vector<8x1xf32>
      %51 = math.rsqrt %50 : vector<8x1xf32>
      %52 = vector.broadcast %51 : vector<8x1xf32> to vector<8x128xf32>
      %53 = arith.mulf %45, %52 : vector<8x128xf32>
      %54 = arith.mulf %8, %53 : vector<8x128xf32>
      %cst_30 = arith.constant dense<0.000000e+00> : vector<8xf32>
      %55 = vector.multi_reduction <add>, %54, %cst_30 [1] : vector<8x128xf32> to vector<8xf32>
      %56 = vector.shape_cast %55 : vector<8xf32> to vector<8x1xf32>
      %c0_31 = arith.constant 0 : index
      %c0_32 = arith.constant 0 : index
      %57 = vector.load %arg8[%c0_31, %c0_32] : memref<8x1xf32, #tpu.memory_space<vmem>>, vector<8x1xf32>
      tpu.vector_store %arg8[%c0_31, %c0_32], %56 {strides = array<i32>} : memref<8x1xf32, #tpu.memory_space<vmem>>, vector<8x1xf32>,
    } else {
    }
    %cst_7 = arith.constant dense<0.000000e+00> : vector<8x8xf32>
    %21 = tpu.matmul %8, %17, %cst_7 {dimension_numbers = #tpu.dot_dimension_numbers<[1], [1], [0], [0], [0, 0, 1, 0], [], []>} : vector<8x128xf32>, vector<8x128xf32>, vector<8x8xf32> -> vector<8x8xf32>
    %c0_8 = arith.constant 0 : index
    %c0_9 = arith.constant 0 : index
    %22 = vector.load %arg6[%c0_8, %c0_9] : memref<8x1xf32, #tpu.memory_space<vmem>>, vector<8x1xf32>
    %cst_10 = arith.constant dense<0xFF800000> : vector<8xf32>
    %23 = vector.multi_reduction <maximumf>, %21, %cst_10 [1] : vector<8x8xf32> to vector<8xf32>
    %24 = vector.shape_cast %23 : vector<8xf32> to vector<8x1xf32>
    %25 = arith.maximumf %22, %24 : vector<8x1xf32>
    %26 = arith.subf %22, %25 : vector<8x1xf32>
    %27 = math.exp %26 : vector<8x1xf32>
    %c0_11 = arith.constant 0 : index
    %c0_12 = arith.constant 0 : index
    %28 = vector.load %arg7[%c0_11, %c0_12] : memref<8x1xf32, #tpu.memory_space<vmem>>, vector<8x1xf32>
    %29 = arith.mulf %27, %28 : vector<8x1xf32>
    %30 = vector.broadcast %25 : vector<8x1xf32> to vector<8x8xf32>
    %31 = arith.subf %21, %30 : vector<8x8xf32>
    %32 = math.exp %31 : vector<8x8xf32>
    %cst_13 = arith.constant dense<0.000000e+00> : vector<8xf32>
    %33 = vector.multi_reduction <add>, %32, %cst_13 [1] : vector<8x8xf32> to vector<8xf32>
    %34 = vector.shape_cast %33 : vector<8xf32> to vector<8x1xf32>
    %35 = arith.addf %29, %34 : vector<8x1xf32>
    %c0_14 = arith.constant 0 : index
    %c0_15 = arith.constant 0 : index
    %36 = vector.load %arg7[%c0_14, %c0_15] : memref<8x1xf32, #tpu.memory_space<vmem>>, vector<8x1xf32>
    tpu.vector_store %arg7[%c0_14, %c0_15], %35 {strides = array<i32>} : memref<8x1xf32, #tpu.memory_space<vmem>>, vector<8x1xf32>,
    %c0_16 = arith.constant 0 : index
    %c0_17 = arith.constant 0 : index
    %37 = vector.load %arg6[%c0_16, %c0_17] : memref<8x1xf32, #tpu.memory_space<vmem>>, vector<8x1xf32>
    tpu.vector_store %arg6[%c0_16, %c0_17], %25 {strides = array<i32>} : memref<8x1xf32, #tpu.memory_space<vmem>>, vector<8x1xf32>,
    %c0_i32_18 = arith.constant 0 : i32
    %38 = arith.cmpi eq, %arg1, %c0_i32_18 : i32
    %39 = arith.extui %38 : i1 to i32
    %c0_i32_19 = arith.constant 0 : i32
    %40 = arith.cmpi ne, %39, %c0_i32_19 : i32
    scf.if %40 {
      %c0_20 = arith.constant 0 : index
      %c0_21 = arith.constant 0 : index
      %41 = vector.load %arg6[%c0_20, %c0_21] : memref<8x1xf32, #tpu.memory_space<vmem>>, vector<8x1xf32>
      %c0_22 = arith.constant 0 : index
      %c0_23 = arith.constant 0 : index
      %42 = vector.load %arg7[%c0_22, %c0_23] : memref<8x1xf32, #tpu.memory_space<vmem>>, vector<8x1xf32>
      %43 = math.log %42 : vector<8x1xf32>
      %44 = arith.addf %41, %43 : vector<8x1xf32>
      %c0_24 = arith.constant 0 : index
      %c0_25 = arith.constant 0 : index
      %45 = vector.load %arg8[%c0_24, %c0_25] : memref<8x1xf32, #tpu.memory_space<vmem>>, vector<8x1xf32>
      %46 = arith.subf %44, %45 : vector<8x1xf32>
      %c0_26 = arith.constant 0 : index
      %c0_27 = arith.constant 0 : index
      %47 = vector.load %arg5[%c0_26, %c0_27] : memref<8x1xf32, #tpu.memory_space<vmem>>, vector<8x1xf32>
      tpu.vector_store %arg5[%c0_26, %c0_27], %46 {strides = array<i32>} : memref<8x1xf32, #tpu.memory_space<vmem>>, vector<8x1xf32>,
    } else {
    }
    return
  }
  func.func @transform_0(%arg0: i32, %arg1: i32) -> (i32, i32) {
    %c0_i32 = arith.constant 0 : i32
    %c0_i32_0 = arith.constant 0 : i32
    return %arg0, %c0_i32 : i32, i32
  }
  func.func @transform_1(%arg0: i32, %arg1: i32) -> (i32, i32) {
    %c0_i32 = arith.constant 0 : i32
    %c0_i32_0 = arith.constant 0 : i32
    return %arg1, %c0_i32 : i32, i32
  }
  func.func @transform_2(%arg0: i32, %arg1: i32) -> (i32, i32) {
    %c0_i32 = arith.constant 0 : i32
    %c0_i32_0 = arith.constant 0 : i32
    return %arg0, %c0_i32 : i32, i32
  }
  func.func @transform_3(%arg0: i32, %arg1: i32) -> (i32, i32) {
    %c0_i32 = arith.constant 0 : i32
    %c0_i32_0 = arith.constant 0 : i32
    return %arg0, %c0_i32 : i32, i32
  }
}

</mosaic_0001>

<bundles_post_ra>
// kernel: tpu_custom_call.1
= control target key start
LH: loop header
LB: loop body
LE: loop exit
PB: predicated region body
PF: predicated region fallthrough
CT: control target
= control target key end

     0   :  { %8 = vsyncpa [#allocation6], 0  ;;  %s319_s0 = inlined_call_operand.hbm [shape: f32[8,128], index: 0, kind: input, shape index: {}]   ;;  %s320_s1 = inlined_call_operand.hbm [shape: f32[8,128], index: 1, kind: input, shape index: {}]   ;;  %s321_s2 = inlined_call_operand.hbm [shape: f32[8,128], index: 2, kind: input, shape index: {}]   ;;  %s322_s3 = inlined_call_operand.vmem [shape: f32[8,1], index: 3, kind: output, shape index: {}]  }
   0x1   :  { %9 = vsyncpa [#allocation8], 0  ;;  %s26_s14 = sshll.u32 %s320_s1, 4  ;;  %s273_s15 = smov [#allocation7]   ;;  %s27_s14 = int_to_ptr.hbm [resolvable:$true] %s26_s14 }
   0x2   :  { %s28_s16 = sshll.u32 %s273_s15, 4  ;;  %s15_s19 = sshll.u32 %s319_s0, 4  ;;  %s29_s16 = int_to_ptr.vmem [resolvable:$true] %s28_s16  ;;  %s16_s19 = int_to_ptr.hbm [resolvable:$true] %s15_s19 }
   0x3   :  { %31 = dma.hbm_to_vmem [thread:$0]  %s27_s14, 128, %s29_s16, [#allocation8]  }
   0x4   :  { %s274_s20 = smov [#allocation5]   ;;  %s37_s24 = sshll.u32 %s321_s2, 4  ;;  %s38_s24 = int_to_ptr.hbm [resolvable:$true] %s37_s24 }
   0x5   :  { %s17_s21 = sshll.u32 %s274_s20, 4  ;;  %s275_s1 = smov [#allocation9]   ;;  %s18_s21 = int_to_ptr.vmem [resolvable:$true] %s17_s21 }
   0x6   :  { %20 = dma.hbm_to_vmem [thread:$0]  %s16_s19, 128, %s18_s21, [#allocation6]  }
   0x7   :  { %s39_s25 = sshll.u32 %s275_s1, 4  ;;  %s40_s25 = int_to_ptr.vmem [resolvable:$true] %s39_s25 }
   0x8   :  { %42 = dma.hbm_to_vmem [thread:$0]  %s38_s24, 128, %s40_s25, [#allocation8]  }
   0x9   :  { %269 = dma.done.wait [#allocation6], 128  }
   0xa   :  { %270 = vsyncadd [#allocation6], 4294967168 }
   0xb   :  { %271 = dma.done.wait [#allocation8], 256  }
   0xc   :  { %272 = vsyncadd [#allocation8], 4294967040  ;;  %v71_v0 = vld [vmem:[#allocation7] sm:$0xff]  ;;  %v55_v2 = vld [vmem:[#allocation5] sm:$0xff]  ;;  %vm91_vm6 = vcmask 7168   ;;  %v276_v24 = vmov -inf  }
   0xd   :  { %v72_v1 = vmul.f32 %v71_v0, %v71_v0  ;;  %v56_v3 = vmul.f32 %v55_v2, %v55_v2  ;;  %92 = vst.msk [vmem:[#allocation2] sm:$0xff] %vm91_vm6, %v276_v24  ;;  %vm135_vm7 = vcmask 64512   ;;  %v94_v27 = vld [vmem:[#allocation9] sm:$0xff]  ;;  %v277_v29 = vmov 0  }
   0xe   :  { %v95_v28 = vmul.f32 %v94_v27, %v94_v27  ;;  %183 = vset.pattern.permute.xlu2 %v277_v29  ;;  %184 = vset.pattern.permute.xlu0 %v277_v29  ;;  %v278_v30 = vmov 0.0  }
   0xf   :  { %73 = vadd.xlane.f32.xlu0 %v72_v1  ;;  %93 = vst.msk [vmem:[#allocation3] sm:$0xff] %vm91_vm6, %v278_v30 }
  0x14   :  { %v134_v31 = vld [vmem:[#allocation2] sm:$0xff] }
  0x16   :  { %v143_v54 = vld [vmem:[#allocation3] sm:$0xff] }
  0x17   :  { %57 = vadd.xlane.f32.xlu0 %v56_v3 }
  0x82   :  { %v74_v4 = vpop.xlane.xlu0 %73 }
  0x83   :  { %v75_v5 = vmax.f32 %v74_v4, 1e-24 }
  0x85   :  { %185 = vrsqrt.f32 %v75_v5  ;;  %vm82_vm1 = vweird.f32 %v75_v5 }
  0x8a   :  { %v58_v6 = vpop.xlane.xlu0 %57 }
  0x8b   :  { %v186_v7 = vpop.eup %185  ;;  %v59_v8 = vmax.f32 %v58_v6, 1e-24 }
  0x8c   :  { %v77_v9 = vmul.f32 %v186_v7, %v75_v5  ;;  %vm83_vm0 = vweird.f32 %v186_v7 }
  0x8d   :  { %187 = vrsqrt.f32 %v59_v8  ;;  %vm84_vm2 = vmor %vm82_vm1, %vm83_vm0  ;;  %vm66_vm4 = vweird.f32 %v59_v8 }
  0x8e   :  { %v78_v10 = vmul.f32 %v186_v7, %v77_v9 }
  0x90   :  { %v79_v11 = vmul.f32 0.5, %v78_v10 }
  0x92   :  { %v80_v12 = vsub.f32 1.5, %v79_v11 }
  0x93   :  { %v188_v13 = vpop.eup %187 }
  0x94   :  { %v61_v14 = vmul.f32 %v188_v13, %v59_v8  ;;  %v81_v15 = vmul.f32 %v186_v7, %v80_v12  ;;  %vm67_vm3 = vweird.f32 %v188_v13 }
  0x95   :  { %vm68_vm5 = vmor %vm66_vm4, %vm67_vm3 }
  0x96   :  { %v62_v16 = vmul.f32 %v188_v13, %v61_v14  ;;  %v85_v17 = vsel %vm84_vm2, %v186_v7, %v81_v15 }
  0x97   :  { %v86_v18 = vmul.f32 %v85_v17, %v71_v0 }
  0x98   :  { %v63_v19 = vmul.f32 0.5, %v62_v16 }
  0x99   :  { %129 = vmatpush.xpose.msra.mxu0 %v86_v18 }
  0x9a   :  { %v64_v20 = vsub.f32 1.5, %v63_v19 }
  0x9c   :  { %v65_v21 = vmul.f32 %v188_v13, %v64_v20 }
  0x9e   :  { %v69_v22 = vsel %vm68_vm5, %v188_v13, %v65_v21 }
  0x9f   :  { %v70_v23 = vmul.f32 %v69_v22, %v55_v2 }
  0xa1   :  { %130 = vmatmul.f32.vlgmr.msra.gmra.mxu0 %v70_v23 }
 0x11e   :  { %v131_v25 = vpop.f32.mrf.mxu0 }
 0x11f   :  { %v136_v26 = vsel %vm135_vm7, %v131_v25, -inf }
 0x120   :  { %137 = vmax.xlane.f32.xlu1 %v136_v26 }
 0x128   :  { %96 = vadd.xlane.f32.xlu1 %v95_v28 }
 0x193   :  { %v138_v32 = vpop.xlane.xlu1 %137 }
 0x194   :  { %v139_v33 = vmax.f32 %v134_v31, %v138_v32 }
 0x196   :  { %v140_v34 = vsub.f32 %v134_v31, %v139_v33  ;;  %159 = vst.msk [vmem:[#allocation2] sm:$0xff] %vm91_vm6, %v139_v33  ;;  %147 = vperm.xlu2 %183, %v139_v33  }
 0x198   :  { %v141_v52 = vmul.f32 1.442695, %v140_v34 }
 0x19b   :  { %v97_v35 = vpop.xlane.xlu1 %96 }
 0x19c   :  { %v98_v36 = vmax.f32 %v97_v35, 1e-24 }
 0x19d   :  { %v163_v61 = vld [vmem:[#allocation2] sm:$0xff] }
 0x19e   :  { %189 = vrsqrt.f32 %v98_v36  ;;  %vm105_vm8 = vweird.f32 %v98_v36 }
 0x1a4   :  { %v190_v37 = vpop.eup %189 }
 0x1a5   :  { %v100_v38 = vmul.f32 %v190_v37, %v98_v36  ;;  %vm106_vm9 = vweird.f32 %v190_v37 }
 0x1a6   :  { %vm107_vm10 = vmor %vm105_vm8, %vm106_vm9 }
 0x1a7   :  { %v101_v39 = vmul.f32 %v190_v37, %v100_v38 }
 0x1a9   :  { %v102_v40 = vmul.f32 0.5, %v101_v39 }
 0x1ab   :  { %v103_v41 = vsub.f32 1.5, %v102_v40 }
 0x1ad   :  { %v104_v42 = vmul.f32 %v190_v37, %v103_v41 }
 0x1af   :  { %v108_v43 = vsel %vm107_vm10, %v190_v37, %v104_v42 }
 0x1b0   :  { %v109_v44 = vmul.f32 %v108_v43, %v94_v27 }
 0x1b2   :  { %v110_v45 = vmul.f32 %v109_v44, %v70_v23 }
 0x1b4   :  { %111 = vadd.xlane.f32.xlu0 %v110_v45 }
 0x1f0   :  { %v148_v46 = vpop.permute.xlu2 %147 }
 0x1f1   :  { %v150_v47 = vsub.f32 %v131_v25, %v148_v46 }
 0x1f3   :  { %v151_v48 = vmul.f32 1.442695, %v150_v47 }
 0x1f5   :  { %191 = vpow2.f32 %v151_v48 }
 0x1f6   :  { %193 = vpow2.f32 %v141_v52 }
 0x1fb   :  { %v192_v49 = vpop.eup %191 }
 0x1fc   :  { %v153_v50 = vsel %vm135_vm7, %v192_v49, 0.0  ;;  %v194_v53 = vpop.eup %193 }
 0x1fd   :  { %154 = vadd.xlane.f32.xlu2 %v153_v50  ;;  %v144_v55 = vmul.f32 %v194_v53, %v143_v54 }
 0x227   :  { %v112_v51 = vpop.xlane.xlu0 %111 }
 0x228   :  { %113 = vst.msk [vmem:[#allocation4] sm:$0xff] %vm91_vm6, %v112_v51 }
 0x22f   :  { %v168_v63 = vld [vmem:[#allocation4] sm:$0xff] }
 0x270   :  { %v155_v56 = vpop.xlane.xlu2 %154 }
 0x271   :  { %v156_v57 = vadd.f32 %v155_v56, %v144_v55 }
 0x273   :  { %158 = vst.msk [vmem:[#allocation3] sm:$0xff] %vm91_vm6, %v156_v57 }
 0x27a   :  { %v164_v58 = vld [vmem:[#allocation3] sm:$0xff] }
 0x27b   :  { %195 = vlog2.f32 %v164_v58 }
 0x281   :  { %v196_v59 = vpop.eup %195 }
 0x282   :  { %v166_v60 = vmul.f32 0.6931472, %v196_v59 }
 0x284   :  { %v167_v62 = vadd.f32 %v166_v60, %v163_v61 }
 0x286   :  { %v169_v0 = vsub.f32 %v167_v62, %v168_v63 }
 0x288   :  { %170 = vst.msk [vmem:[%s322_s3] sm:$0xff] %vm91_vm6, %v169_v0 }
 0x289   :  { %175 = vsyncpa [#allocation6], 1 }
 0x28a   :  { %176 = vsyncpa [#allocation8], 1 }

</bundles_post_ra>
